<compile_context>
chip_gen: v7x
topology: tpu7x:2x2x1
jax: 0.10.0
libtpu: 0.0.40
codegen_flags: <defaults>
</compile_context>

<pallas_src>
import functools

import jax
import jax.numpy as jnp
from jax.experimental import pallas as pl
from jax.experimental.pallas import tpu as pltpu

_NEG_BIG = -1e30          # finite "-inf": avoids inf-inf NaNs in the online LSE
_MAX_TILE_ROWS = 4096     # beyond this the 0.35us/step overhead is already <1%


def _round_up(x: int, m: int) -> int:
    return ((x + m - 1) // m) * m


def _vmem_limit_bytes() -> int:
    """~3/4 of physical VMEM: 96 MiB on v5e/v6e (128 MiB), 48 MiB on v7x (64 MiB)."""
    cap = 64 * 1024 * 1024  # conservative fallback (v7x-sized)
    try:
        info = pltpu.get_tpu_info()
        cap = int(getattr(info, "vmem_capacity_bytes", cap)) or cap
    except Exception:
        pass
    return (cap * 3) // 4


def _cosent_kernel(text_ref, pos_ref, neg_ref, out_neg_ref, out_pos_ref,
                   m_neg, s_neg, m_pos, s_pos,
                   *, inv_temperature, inv_eps, batch_size, tile_rows,
                   tiles_per_shard, needs_mask):
    t = pl.program_id(1)  # reduction (arbitrary) axis within this shard

    @pl.when(t == 0)
    def _init():
        m_neg[...] = jnp.full_like(m_neg, _NEG_BIG)
        m_pos[...] = jnp.full_like(m_pos, _NEG_BIG)
        s_neg[...] = jnp.zeros_like(s_neg)
        s_pos[...] = jnp.zeros_like(s_pos)

    x = text_ref[...].astype(jnp.float32)   # (TB, D)
    p = pos_ref[...].astype(jnp.float32)
    n = neg_ref[...].astype(jnp.float32)

    # Per-row cosine similarities (reduce over the lane / feature axis).
    xx = jnp.sum(x * x, axis=-1, keepdims=True)   # (TB, 1)
    pp = jnp.sum(p * p, axis=-1, keepdims=True)
    nn = jnp.sum(n * n, axis=-1, keepdims=True)
    xp = jnp.sum(x * p, axis=-1, keepdims=True)
    xn = jnp.sum(x * n, axis=-1, keepdims=True)

    # Per-norm eps clamp, matching torch.cosine_similarity:
    #   den = max(||a||, eps) * max(||b||, eps)  <=>  inv = min(rsqrt(aa), 1/eps)
    # rsqrt runs on the EUP (its own VLIW slot) and removes the VPU divides.
    inv_x = jnp.minimum(jax.lax.rsqrt(xx), jnp.float32(inv_eps))
    inv_p = jnp.minimum(jax.lax.rsqrt(pp), jnp.float32(inv_eps))
    inv_n = jnp.minimum(jax.lax.rsqrt(nn), jnp.float32(inv_eps))
    sim_pos = xp * inv_x * inv_p * jnp.float32(inv_temperature)   # (TB, 1)
    sim_neg = xn * inv_x * inv_n * jnp.float32(inv_temperature)   # (TB, 1)

    def _update(neg_vals, pos_vals):
        # Online logsumexp accumulation for lse(sim_neg) and lse(-sim_pos).
        for vals, m_ref, s_ref in ((neg_vals, m_neg, s_neg),
                                   (pos_vals, m_pos, s_pos)):
            m_old = m_ref[...]                                  # (1, 1)
            m_new = jnp.maximum(m_old, jnp.max(vals, axis=0, keepdims=True))
            s_ref[...] = (s_ref[...] * jnp.exp(m_old - m_new)
                          + jnp.sum(jnp.exp(vals - m_new), axis=0, keepdims=True))
            m_ref[...] = m_new

    if needs_mask:
        c = pl.program_id(0)
        tile_idx = c * tiles_per_shard + t          # logical (unclamped) tile idx
        tile_clean = (tile_idx + 1) * tile_rows <= batch_size

        @pl.when(tile_clean)
        def _fast():
            _update(sim_neg, -sim_pos)

        @pl.when(jnp.logical_not(tile_clean))
        def _masked():
            # Only ragged-tail / out-of-range (clamped) tiles pay for the mask.
            row = (tile_idx * tile_rows
                   + jax.lax.broadcasted_iota(jnp.int32, (tile_rows, 1), 0))
            valid = row < batch_size
            _update(jnp.where(valid, sim_neg, _NEG_BIG),
                    jnp.where(valid, -sim_pos, _NEG_BIG))
    else:
        _update(sim_neg, -sim_pos)

    @pl.when(t == tiles_per_shard - 1)
    def _finalize():
        # Partial per-shard logsumexps; combined (softplus + /B) in the wrapper.
        out_neg_ref[...] = m_neg[...] + jnp.log(s_neg[...])
        out_pos_ref[...] = m_pos[...] + jnp.log(s_pos[...])


def cosent_loss(text_embeddings, text_embeddings_pos, text_embeddings_neg,
                temperature: float = 0.05, margin: float = 0.0,
                tile_rows: int | None = None, num_shards: int = 2):
    """Pallas TPU implementation of CoSentLoss.forward (returns a scalar)."""
    del margin  # unused in the torch forward pass
    b, d = text_embeddings.shape
    eps = 1e-8

    itemsize = jnp.dtype(text_embeddings.dtype).itemsize
    sub = max(8, 32 // itemsize)          # sublane packing: 8 f32, 16 bf16, 32 i8

    vmem_limit = _vmem_limit_bytes()
    if tile_rows is None:
        # VMEM bytes per batch row: 3 inputs x 2 pipeline buffers, f32 cast copies
        # (only when inputs are narrower than f32), plus ~4 live f32 temporaries.
        per_row = d * (6 * itemsize + (3 * 4 if itemsize < 4 else 0) + 4 * 4)
        budget = int(vmem_limit * 0.85)
        budget_rows = max(sub, (budget // per_row) // sub * sub)
        tile_rows = min(budget_rows, _MAX_TILE_ROWS,
                        _round_up(pl.cdiv(b, max(num_shards, 1)), sub))
    tile_rows = max(sub, _round_up(tile_rows, sub))

    n_tiles = pl.cdiv(b, tile_rows)
    num_shards = max(1, min(num_shards, n_tiles))
    tiles_per_shard = pl.cdiv(n_tiles, num_shards)
    needs_mask = (b % tile_rows != 0) or (n_tiles % num_shards != 0)

    kernel = functools.partial(
        _cosent_kernel,
        inv_temperature=1.0 / temperature,
        inv_eps=1.0 / eps,
        batch_size=b,
        tile_rows=tile_rows,
        tiles_per_shard=tiles_per_shard,
        needs_mask=needs_mask)

    def row_block(c, t):
        # Clamp logical tile index; out-of-range tiles are fully masked in-kernel.
        return (jnp.minimum(c * tiles_per_shard + t, n_tiles - 1), 0)

    in_spec = pl.BlockSpec((tile_rows, d), row_block)
    part_spec = pl.BlockSpec((1, 1), lambda c, t: (c, 0))

    part_neg, part_pos = pl.pallas_call(
        kernel,
        out_shape=(jax.ShapeDtypeStruct((num_shards, 1), jnp.float32),
                   jax.ShapeDtypeStruct((num_shards, 1), jnp.float32)),
        grid_spec=pltpu.PrefetchScalarGridSpec(
            num_scalar_prefetch=0,
            grid=(num_shards, tiles_per_shard),
            in_specs=[in_spec, in_spec, in_spec],
            out_specs=[part_spec, part_spec],
            scratch_shapes=[pltpu.VMEM((1, 1), jnp.float32)] * 4),
        compiler_params=pltpu.CompilerParams(
            dimension_semantics=("parallel", "arbitrary"),
            vmem_limit_bytes=int(vmem_limit)),
    )(text_embeddings, text_embeddings_pos, text_embeddings_neg)

    # Combine per-shard partials:  z = lse_i(sim_neg) + lse_j(-sim_pos);
    # appended 0.0 entry -> logaddexp(z, 0) = softplus(z).
    lse_neg = jax.nn.logsumexp(part_neg[:, 0])
    lse_pos = jax.nn.logsumexp(part_pos[:, 0])
    z = lse_neg + lse_pos
    return jnp.logaddexp(z, jnp.float32(0.0)) / jnp.float32(b)


def _reference(text, pos, neg, temperature: float = 0.05):
    """Pure-JAX mirror of the PyTorch forward (cosine_similarity + logsumexp)."""
    text = text.astype(jnp.float32)
    pos = pos.astype(jnp.float32)
    neg = neg.astype(jnp.float32)
    eps = 1e-8

    def cos(a, b):
        na = jnp.maximum(jnp.linalg.norm(a, axis=-1), eps)
        nb = jnp.maximum(jnp.linalg.norm(b, axis=-1), eps)
        return jnp.sum(a * b, axis=-1) / (na * nb)

    sim_pos = cos(text, pos) / temperature
    sim_neg = cos(text, neg) / temperature
    diff = sim_neg[:, None] - sim_pos[None, :]
    dif = jnp.concatenate([diff.reshape(-1), jnp.zeros((1,), diff.dtype)])
    return jax.nn.logsumexp(dif) / text.shape[0]


if __name__ == "__main__":
    key = jax.random.PRNGKey(0)
    k = jax.random.split(key, 9)

    # Case 1: batch=8, hidden=32, f32 (single tile / single shard).
    B, D = 8, 32
    text = jax.random.normal(k[0], (B, D), dtype=jnp.float32)
    pos = jax.random.normal(k[1], (B, D), dtype=jnp.float32)
    neg = jax.random.normal(k[2], (B, D), dtype=jnp.float32)
    out = jax.block_until_ready(cosent_loss(text, pos, neg))
    ref = _reference(text, pos, neg)
    assert jnp.allclose(out, ref, rtol=1e-4, atol=1e-4), (out, ref)

    # Case 2: batch not a multiple of the sublane tile (exercises row masking).
    B2 = 6
    text2 = jax.random.normal(k[3], (B2, D), dtype=jnp.float32)
    pos2 = jax.random.normal(k[4], (B2, D), dtype=jnp.float32)
    neg2 = jax.random.normal(k[5], (B2, D), dtype=jnp.float32)
    out2 = jax.block_until_ready(cosent_loss(text2, pos2, neg2))
    ref2 = _reference(text2, pos2, neg2)
    assert jnp.allclose(out2, ref2, rtol=1e-4, atol=1e-4), (out2, ref2)

    # Case 3: bf16 inputs passed straight through (cast happens in-kernel).
    out3 = jax.block_until_ready(
        cosent_loss(text.astype(jnp.bfloat16), pos.astype(jnp.bfloat16),
                    neg.astype(jnp.bfloat16)))
    ref3 = _reference(text.astype(jnp.bfloat16), pos.astype(jnp.bfloat16),
                      neg.astype(jnp.bfloat16))
    assert jnp.allclose(out3, ref3, rtol=1e-3, atol=1e-3), (out3, ref3)

    # Case 4: multi-tile + 2-shard path with ragged tail and a clamped OOB tile
    # (b=20, tile_rows=8 -> 3 real tiles split across 2 shards of 2 tiles each).
    B4 = 20
    text4 = jax.random.normal(k[6], (B4, D), dtype=jnp.float32)
    pos4 = jax.random.normal(k[7], (B4, D), dtype=jnp.float32)
    neg4 = jax.random.normal(k[8], (B4, D), dtype=jnp.float32)
    out4 = jax.block_until_ready(
        cosent_loss(text4, pos4, neg4, tile_rows=8, num_shards=2))
    ref4 = _reference(text4, pos4, neg4)
    assert jnp.allclose(out4, ref4, rtol=1e-4, atol=1e-4), (out4, ref4)

    print("KERNEL_OK")
</pallas_src>

<mosaic_0001>
module attributes {stable_mosaic.version = 11 : i64} {
  func.func @_cosent_kernel(%arg0: i32, %arg1: i32, %arg2: memref<8x32xf32, #tpu.memory_space<vmem>>, %arg3: memref<8x32xf32, #tpu.memory_space<vmem>>, %arg4: memref<8x32xf32, #tpu.memory_space<vmem>>, %arg5: memref<1x1xf32, #tpu.memory_space<vmem>>, %arg6: memref<1x1xf32, #tpu.memory_space<vmem>>, %arg7: memref<1x1xf32, #tpu.memory_space<vmem>>, %arg8: memref<1x1xf32, #tpu.memory_space<vmem>>, %arg9: memref<1x1xf32, #tpu.memory_space<vmem>>, %arg10: memref<1x1xf32, #tpu.memory_space<vmem>>) attributes {dimension_semantics = [#tpu.dimension_semantics<parallel>, #tpu.dimension_semantics<arbitrary>], iteration_bounds = array<i64: 1, 1>, scalar_prefetch = 0 : i64, scratch_operands = 4 : i64, tpu.core_type = #tpu.core_type<tc>, window_params = [{transform_indices = @transform_0, window_bounds = array<i64: 8, 32>}, {transform_indices = @transform_1, window_bounds = array<i64: 8, 32>}, {transform_indices = @transform_2, window_bounds = array<i64: 8, 32>}, {transform_indices = @transform_3, window_bounds = array<i64: 1, 1>}, {transform_indices = @transform_4, window_bounds = array<i64: 1, 1>}]} {
    %c0_i32 = arith.constant 0 : i32
    %0 = arith.cmpi eq, %arg1, %c0_i32 : i32
    %1 = arith.extui %0 : i1 to i32
    %c0_i32_0 = arith.constant 0 : i32
    %2 = arith.cmpi ne, %1, %c0_i32_0 : i32
    scf.if %2 {
      %cst_38 = arith.constant -1.000000e+30 : f32
      %75 = vector.broadcast %cst_38 : f32 to vector<1x1xf32>
      %c0_39 = arith.constant 0 : index
      %c0_40 = arith.constant 0 : index
      %76 = vector.load %arg7[%c0_39, %c0_40] : memref<1x1xf32, #tpu.memory_space<vmem>>, vector<1x1xf32>
      tpu.vector_store %arg7[%c0_39, %c0_40], %75 {strides = array<i32>} : memref<1x1xf32, #tpu.memory_space<vmem>>, vector<1x1xf32>,
      %cst_41 = arith.constant -1.000000e+30 : f32
      %77 = vector.broadcast %cst_41 : f32 to vector<1x1xf32>
      %c0_42 = arith.constant 0 : index
      %c0_43 = arith.constant 0 : index
      %78 = vector.load %arg9[%c0_42, %c0_43] : memref<1x1xf32, #tpu.memory_space<vmem>>, vector<1x1xf32>
      tpu.vector_store %arg9[%c0_42, %c0_43], %77 {strides = array<i32>} : memref<1x1xf32, #tpu.memory_space<vmem>>, vector<1x1xf32>,
      %cst_44 = arith.constant 0.000000e+00 : f32
      %79 = vector.broadcast %cst_44 : f32 to vector<1x1xf32>
      %c0_45 = arith.constant 0 : index
      %c0_46 = arith.constant 0 : index
      %80 = vector.load %arg8[%c0_45, %c0_46] : memref<1x1xf32, #tpu.memory_space<vmem>>, vector<1x1xf32>
      tpu.vector_store %arg8[%c0_45, %c0_46], %79 {strides = array<i32>} : memref<1x1xf32, #tpu.memory_space<vmem>>, vector<1x1xf32>,
      %cst_47 = arith.constant 0.000000e+00 : f32
      %81 = vector.broadcast %cst_47 : f32 to vector<1x1xf32>
      %c0_48 = arith.constant 0 : index
      %c0_49 = arith.constant 0 : index
      %82 = vector.load %arg10[%c0_48, %c0_49] : memref<1x1xf32, #tpu.memory_space<vmem>>, vector<1x1xf32>
      tpu.vector_store %arg10[%c0_48, %c0_49], %81 {strides = array<i32>} : memref<1x1xf32, #tpu.memory_space<vmem>>, vector<1x1xf32>,
    } else {
    }
    %c0 = arith.constant 0 : index
    %c0_1 = arith.constant 0 : index
    %3 = vector.load %arg2[%c0, %c0_1] : memref<8x32xf32, #tpu.memory_space<vmem>>, vector<8x32xf32>
    %c0_2 = arith.constant 0 : index
    %c0_3 = arith.constant 0 : index
    %4 = vector.load %arg3[%c0_2, %c0_3] : memref<8x32xf32, #tpu.memory_space<vmem>>, vector<8x32xf32>
    %c0_4 = arith.constant 0 : index
    %c0_5 = arith.constant 0 : index
    %5 = vector.load %arg4[%c0_4, %c0_5] : memref<8x32xf32, #tpu.memory_space<vmem>>, vector<8x32xf32>
    %6 = arith.mulf %3, %3 : vector<8x32xf32>
    %cst = arith.constant dense<0.000000e+00> : vector<8xf32>
    %7 = vector.multi_reduction <add>, %6, %cst [1] : vector<8x32xf32> to vector<8xf32>
    %8 = vector.shape_cast %7 : vector<8xf32> to vector<8x1xf32>
    %9 = arith.mulf %4, %4 : vector<8x32xf32>
    %cst_6 = arith.constant dense<0.000000e+00> : vector<8xf32>
    %10 = vector.multi_reduction <add>, %9, %cst_6 [1] : vector<8x32xf32> to vector<8xf32>
    %11 = vector.shape_cast %10 : vector<8xf32> to vector<8x1xf32>
    %12 = arith.mulf %5, %5 : vector<8x32xf32>
    %cst_7 = arith.constant dense<0.000000e+00> : vector<8xf32>
    %13 = vector.multi_reduction <add>, %12, %cst_7 [1] : vector<8x32xf32> to vector<8xf32>
    %14 = vector.shape_cast %13 : vector<8xf32> to vector<8x1xf32>
    %15 = arith.mulf %3, %4 : vector<8x32xf32>
    %cst_8 = arith.constant dense<0.000000e+00> : vector<8xf32>
    %16 = vector.multi_reduction <add>, %15, %cst_8 [1] : vector<8x32xf32> to vector<8xf32>
    %17 = vector.shape_cast %16 : vector<8xf32> to vector<8x1xf32>
    %18 = arith.mulf %3, %5 : vector<8x32xf32>
    %cst_9 = arith.constant dense<0.000000e+00> : vector<8xf32>
    %19 = vector.multi_reduction <add>, %18, %cst_9 [1] : vector<8x32xf32> to vector<8xf32>
    %20 = vector.shape_cast %19 : vector<8xf32> to vector<8x1xf32>
    %21 = math.rsqrt %8 : vector<8x1xf32>
    %cst_10 = arith.constant 1.000000e+08 : f32
    %22 = vector.broadcast %cst_10 : f32 to vector<8x1xf32>
    %23 = arith.minimumf %21, %22 : vector<8x1xf32>
    %24 = math.rsqrt %11 : vector<8x1xf32>
    %cst_11 = arith.constant 1.000000e+08 : f32
    %25 = vector.broadcast %cst_11 : f32 to vector<8x1xf32>
    %26 = arith.minimumf %24, %25 : vector<8x1xf32>
    %27 = math.rsqrt %14 : vector<8x1xf32>
    %cst_12 = arith.constant 1.000000e+08 : f32
    %28 = vector.broadcast %cst_12 : f32 to vector<8x1xf32>
    %29 = arith.minimumf %27, %28 : vector<8x1xf32>
    %30 = arith.mulf %17, %23 : vector<8x1xf32>
    %31 = arith.mulf %30, %26 : vector<8x1xf32>
    %cst_13 = arith.constant 2.000000e+01 : f32
    %32 = vector.broadcast %cst_13 : f32 to vector<8x1xf32>
    %33 = arith.mulf %31, %32 : vector<8x1xf32>
    %34 = arith.mulf %20, %23 : vector<8x1xf32>
    %35 = arith.mulf %34, %29 : vector<8x1xf32>
    %cst_14 = arith.constant 2.000000e+01 : f32
    %36 = vector.broadcast %cst_14 : f32 to vector<8x1xf32>
    %37 = arith.mulf %35, %36 : vector<8x1xf32>
    %cst_15 = arith.constant 0.000000e+00 : f32
    %38 = vector.broadcast %cst_15 : f32 to vector<8x1xf32>
    %39 = arith.subf %38, %33 : vector<8x1xf32>
    %c0_16 = arith.constant 0 : index
    %c0_17 = arith.constant 0 : index
    %40 = vector.load %arg7[%c0_16, %c0_17] : memref<1x1xf32, #tpu.memory_space<vmem>>, vector<1x1xf32>
    %cst_18 = arith.constant dense<0xFF800000> : vector<1xf32>
    %41 = vector.multi_reduction <maximumf>, %37, %cst_18 [0] : vector<8x1xf32> to vector<1xf32>
    %42 = vector.shape_cast %41 : vector<1xf32> to vector<1x1xf32>
    %43 = arith.maximumf %40, %42 : vector<1x1xf32>
    %c0_19 = arith.constant 0 : index
    %c0_20 = arith.constant 0 : index
    %44 = vector.load %arg8[%c0_19, %c0_20] : memref<1x1xf32, #tpu.memory_space<vmem>>, vector<1x1xf32>
    %45 = arith.subf %40, %43 : vector<1x1xf32>
    %46 = math.exp %45 : vector<1x1xf32>
    %47 = arith.mulf %44, %46 : vector<1x1xf32>
    %48 = vector.broadcast %43 : vector<1x1xf32> to vector<8x1xf32>
    %49 = arith.subf %37, %48 : vector<8x1xf32>
    %50 = math.exp %49 : vector<8x1xf32>
    %cst_21 = arith.constant dense<0.000000e+00> : vector<1xf32>
    %51 = vector.multi_reduction <add>, %50, %cst_21 [0] : vector<8x1xf32> to vector<1xf32>
    %52 = vector.shape_cast %51 : vector<1xf32> to vector<1x1xf32>
    %53 = arith.addf %47, %52 : vector<1x1xf32>
    %c0_22 = arith.constant 0 : index
    %c0_23 = arith.constant 0 : index
    %54 = vector.load %arg8[%c0_22, %c0_23] : memref<1x1xf32, #tpu.memory_space<vmem>>, vector<1x1xf32>
    tpu.vector_store %arg8[%c0_22, %c0_23], %53 {strides = array<i32>} : memref<1x1xf32, #tpu.memory_space<vmem>>, vector<1x1xf32>,
    %c0_24 = arith.constant 0 : index
    %c0_25 = arith.constant 0 : index
    %55 = vector.load %arg7[%c0_24, %c0_25] : memref<1x1xf32, #tpu.memory_space<vmem>>, vector<1x1xf32>
    tpu.vector_store %arg7[%c0_24, %c0_25], %43 {strides = array<i32>} : memref<1x1xf32, #tpu.memory_space<vmem>>, vector<1x1xf32>,
    %c0_26 = arith.constant 0 : index
    %c0_27 = arith.constant 0 : index
    %56 = vector.load %arg9[%c0_26, %c0_27] : memref<1x1xf32, #tpu.memory_space<vmem>>, vector<1x1xf32>
    %cst_28 = arith.constant dense<0xFF800000> : vector<1xf32>
    %57 = vector.multi_reduction <maximumf>, %39, %cst_28 [0] : vector<8x1xf32> to vector<1xf32>
    %58 = vector.shape_cast %57 : vector<1xf32> to vector<1x1xf32>
    %59 = arith.maximumf %56, %58 : vector<1x1xf32>
    %c0_29 = arith.constant 0 : index
    %c0_30 = arith.constant 0 : index
    %60 = vector.load %arg10[%c0_29, %c0_30] : memref<1x1xf32, #tpu.memory_space<vmem>>, vector<1x1xf32>
    %61 = arith.subf %56, %59 : vector<1x1xf32>
    %62 = math.exp %61 : vector<1x1xf32>
    %63 = arith.mulf %60, %62 : vector<1x1xf32>
    %64 = vector.broadcast %59 : vector<1x1xf32> to vector<8x1xf32>
    %65 = arith.subf %39, %64 : vector<8x1xf32>
    %66 = math.exp %65 : vector<8x1xf32>
    %cst_31 = arith.constant dense<0.000000e+00> : vector<1xf32>
    %67 = vector.multi_reduction <add>, %66, %cst_31 [0] : vector<8x1xf32> to vector<1xf32>
    %68 = vector.shape_cast %67 : vector<1xf32> to vector<1x1xf32>
    %69 = arith.addf %63, %68 : vector<1x1xf32>
    %c0_32 = arith.constant 0 : index
    %c0_33 = arith.constant 0 : index
    %70 = vector.load %arg10[%c0_32, %c0_33] : memref<1x1xf32, #tpu.memory_space<vmem>>, vector<1x1xf32>
    tpu.vector_store %arg10[%c0_32, %c0_33], %69 {strides = array<i32>} : memref<1x1xf32, #tpu.memory_space<vmem>>, vector<1x1xf32>,
    %c0_34 = arith.constant 0 : index
    %c0_35 = arith.constant 0 : index
    %71 = vector.load %arg9[%c0_34, %c0_35] : memref<1x1xf32, #tpu.memory_space<vmem>>, vector<1x1xf32>
    tpu.vector_store %arg9[%c0_34, %c0_35], %59 {strides = array<i32>} : memref<1x1xf32, #tpu.memory_space<vmem>>, vector<1x1xf32>,
    %c0_i32_36 = arith.constant 0 : i32
    %72 = arith.cmpi eq, %arg1, %c0_i32_36 : i32
    %73 = arith.extui %72 : i1 to i32
    %c0_i32_37 = arith.constant 0 : i32
    %74 = arith.cmpi ne, %73, %c0_i32_37 : i32
    scf.if %74 {
      %c0_38 = arith.constant 0 : index
      %c0_39 = arith.constant 0 : index
      %75 = vector.load %arg7[%c0_38, %c0_39] : memref<1x1xf32, #tpu.memory_space<vmem>>, vector<1x1xf32>
      %c0_40 = arith.constant 0 : index
      %c0_41 = arith.constant 0 : index
      %76 = vector.load %arg8[%c0_40, %c0_41] : memref<1x1xf32, #tpu.memory_space<vmem>>, vector<1x1xf32>
      %77 = math.log %76 : vector<1x1xf32>
      %78 = arith.addf %75, %77 : vector<1x1xf32>
      %c0_42 = arith.constant 0 : index
      %c0_43 = arith.constant 0 : index
      %79 = vector.load %arg5[%c0_42, %c0_43] : memref<1x1xf32, #tpu.memory_space<vmem>>, vector<1x1xf32>
      tpu.vector_store %arg5[%c0_42, %c0_43], %78 {strides = array<i32>} : memref<1x1xf32, #tpu.memory_space<vmem>>, vector<1x1xf32>,
      %c0_44 = arith.constant 0 : index
      %c0_45 = arith.constant 0 : index
      %80 = vector.load %arg9[%c0_44, %c0_45] : memref<1x1xf32, #tpu.memory_space<vmem>>, vector<1x1xf32>
      %c0_46 = arith.constant 0 : index
      %c0_47 = arith.constant 0 : index
      %81 = vector.load %arg10[%c0_46, %c0_47] : memref<1x1xf32, #tpu.memory_space<vmem>>, vector<1x1xf32>
      %82 = math.log %81 : vector<1x1xf32>
      %83 = arith.addf %80, %82 : vector<1x1xf32>
      %c0_48 = arith.constant 0 : index
      %c0_49 = arith.constant 0 : index
      %84 = vector.load %arg6[%c0_48, %c0_49] : memref<1x1xf32, #tpu.memory_space<vmem>>, vector<1x1xf32>
      tpu.vector_store %arg6[%c0_48, %c0_49], %83 {strides = array<i32>} : memref<1x1xf32, #tpu.memory_space<vmem>>, vector<1x1xf32>,
    } else {
    }
    return
  }
  func.func @transform_0(%arg0: i32, %arg1: i32) -> (i32, i32) {
    %c1_i32 = arith.constant 1 : i32
    %0 = arith.muli %arg0, %c1_i32 : i32
    %1 = arith.addi %0, %arg1 : i32
    %c0_i32 = arith.constant 0 : i32
    %2 = arith.minsi %1, %c0_i32 : i32
    %c0_i32_0 = arith.constant 0 : i32
    %c0_i32_1 = arith.constant 0 : i32
    return %2, %c0_i32_0 : i32, i32
  }
  func.func @transform_1(%arg0: i32, %arg1: i32) -> (i32, i32) {
    %c1_i32 = arith.constant 1 : i32
    %0 = arith.muli %arg0, %c1_i32 : i32
    %1 = arith.addi %0, %arg1 : i32
    %c0_i32 = arith.constant 0 : i32
    %2 = arith.minsi %1, %c0_i32 : i32
    %c0_i32_0 = arith.constant 0 : i32
    %c0_i32_1 = arith.constant 0 : i32
    return %2, %c0_i32_0 : i32, i32
  }
  func.func @transform_2(%arg0: i32, %arg1: i32) -> (i32, i32) {
    %c1_i32 = arith.constant 1 : i32
    %0 = arith.muli %arg0, %c1_i32 : i32
    %1 = arith.addi %0, %arg1 : i32
    %c0_i32 = arith.constant 0 : i32
    %2 = arith.minsi %1, %c0_i32 : i32
    %c0_i32_0 = arith.constant 0 : i32
    %c0_i32_1 = arith.constant 0 : i32
    return %2, %c0_i32_0 : i32, i32
  }
  func.func @transform_3(%arg0: i32, %arg1: i32) -> (i32, i32) {
    %c0_i32 = arith.constant 0 : i32
    %c0_i32_0 = arith.constant 0 : i32
    return %arg0, %c0_i32 : i32, i32
  }
  func.func @transform_4(%arg0: i32, %arg1: i32) -> (i32, i32) {
    %c0_i32 = arith.constant 0 : i32
    %c0_i32_0 = arith.constant 0 : i32
    return %arg0, %c0_i32 : i32, i32
  }
}

</mosaic_0001>

<bundles_post_ra>
// kernel: tpu_custom_call.1
= control target key start
LH: loop header
LB: loop body
LE: loop exit
PB: predicated region body
PF: predicated region fallthrough
CT: control target
= control target key end

     0   :  { %10 = vsyncpa [#allocation7], 0  ;;  %s490_s0 = inlined_call_operand.hbm [shape: f32[8,32], index: 0, kind: input, shape index: {}]   ;;  %s491_s1 = inlined_call_operand.hbm [shape: f32[8,32], index: 1, kind: input, shape index: {}]   ;;  %s492_s2 = inlined_call_operand.hbm [shape: f32[8,32], index: 2, kind: input, shape index: {}]   ;;  %s493_s3 = inlined_call_operand.hbm [shape: f32[1,1], index: 3, kind: output, shape index: {0}]   ;;  %s494_s4 = inlined_call_operand.hbm [shape: f32[1,1], index: 4, kind: output, shape index: {1}]  }
   0x1   :  { %11 = vsyncpa [#allocation10], 0 }
   0x2   :  { %12 = vsyncpa [#allocation8], 0 }
   0x3   :  { %13 = vsyncpa [#allocation14], 0  ;;  %s383_s15 = smov [#allocation9]   ;;  %s384_s17 = smov [#allocation6]  }
   0x4   :  { %s40_s16 = sshll.u32 %s383_s15, 4  ;;  %s25_s18 = sshll.u32 %s384_s17, 4  ;;  %s41_s16 = int_to_ptr.vmem [resolvable:$true] %s40_s16  ;;  %s26_s18 = int_to_ptr.vmem [resolvable:$true] %s25_s18 }
   0x5   :  { %s265_s21 = scalar_lea.hbm %s491_s1, 128 }
   0x6   :  { %p266_p0 = scmp.ne.s32.totalorder %s491_s1, %s265_s21  ;;  %p269_p1 = scmp.lt.u32.totalorder %s265_s21, %s491_s1 }
   0x8   :  { %p271_p2 = pnand %p269_p1, %p266_p0 }
   0xa   :  { %274 = shalt.err (!%p271_p2)
}
   0xb   :  { %s275_s26 = scalar_lea.vmem %s41_s16, 128  ;;  %p280_p4 = scmp.lt.s32.totalorder %s41_s16, %s41_s16 }
   0xc   :  { %p276_p3 = scmp.ne.s32.totalorder %s41_s16, %s275_s26  ;;  %p281_p5 = scmp.lt.s32.totalorder %s275_s26, %s275_s26 }
   0xe   :  { %p282_p6 = por %p281_p5, %p280_p4 }
  0x10   :  { %p283_p7 = pnand %p282_p6, %p276_p3 }
  0x12   :  { %286 = shalt.err (!%p283_p7)
}
  0x13   :  { %43 = dma.hbm_to_vmem [thread:$0]  %s491_s1, 128, %s41_s16, [#allocation10]  }
  0x14   :  { %s287_s5 = scalar_lea.hbm %s490_s0, 128 }
  0x15   :  { %p288_p8 = scmp.ne.s32.totalorder %s490_s0, %s287_s5  ;;  %p291_p9 = scmp.lt.u32.totalorder %s287_s5, %s490_s0 }
  0x17   :  { %p293_p10 = pnand %p291_p9, %p288_p8 }
  0x19   :  { %296 = shalt.err (!%p293_p10)
}
  0x1a   :  { %s297_s10 = scalar_lea.vmem %s26_s18, 128  ;;  %p302_p12 = scmp.lt.s32.totalorder %s26_s18, %s26_s18 }
  0x1b   :  { %p298_p11 = scmp.ne.s32.totalorder %s26_s18, %s297_s10  ;;  %p303_p13 = scmp.lt.s32.totalorder %s297_s10, %s297_s10 }
  0x1d   :  { %p304_p0 = por %p303_p13, %p302_p12 }
  0x1f   :  { %p305_p1 = pnand %p304_p0, %p298_p11 }
  0x21   :  { %308 = shalt.err (!%p305_p1)
}
  0x22   :  { %28 = dma.hbm_to_vmem [thread:$0]  %s490_s0, 128, %s26_s18, [#allocation7]  }
  0x23   :  { %s385_s12 = smov [#allocation11]   ;;  %s309_s16 = scalar_lea.hbm %s492_s2, 128 }
  0x24   :  { %s55_s13 = sshll.u32 %s385_s12, 4  ;;  %p310_p2 = scmp.ne.s32.totalorder %s492_s2, %s309_s16  ;;  %s56_s13 = int_to_ptr.vmem [resolvable:$true] %s55_s13 }
  0x25   :  { %p313_p3 = scmp.lt.u32.totalorder %s309_s16, %s492_s2 }
  0x27   :  { %p315_p4 = pnand %p313_p3, %p310_p2 }
  0x29   :  { %318 = shalt.err (!%p315_p4)
}
  0x2a   :  { %s319_s22 = scalar_lea.vmem %s56_s13, 128  ;;  %p324_p6 = scmp.lt.s32.totalorder %s56_s13, %s56_s13 }
  0x2b   :  { %p320_p5 = scmp.ne.s32.totalorder %s56_s13, %s319_s22  ;;  %p325_p7 = scmp.lt.s32.totalorder %s319_s22, %s319_s22 }
  0x2d   :  { %p326_p8 = por %p325_p7, %p324_p6 }
  0x2f   :  { %p327_p9 = pnand %p326_p8, %p320_p5 }
  0x31   :  { %330 = shalt.err (!%p327_p9)
}
  0x32   :  { %58 = dma.hbm_to_vmem [thread:$0]  %s492_s2, 128, %s56_s13, [#allocation10]  }
  0x33   :  { %375 = dma.done.wait [#allocation7], 128  }
  0x34   :  { %376 = vsyncadd [#allocation7], 4294967168 }
  0x35   :  { %377 = dma.done.wait [#allocation10], 256  }
  0x36   :  { %378 = vsyncadd [#allocation10], 4294967040  ;;  %v86_v0 = vld [vmem:[#allocation6] sm:$0xff]  ;;  %vm90_vm0 = vcmask 261120   ;;  %v88_v1 = vld [vmem:[#allocation11] sm:$0xff]  ;;  %vm81_vm1 = vcmask 0   ;;  %v137_v33 = vlaneseq }
  0x37   :  { %v87_v2 = vld [vmem:[#allocation9] sm:$0xff]  ;;  %v89_v3 = vmul.f32 %v86_v0, %v86_v0  ;;  %v98_v4 = vmul.f32 %v88_v1, %v88_v1  ;;  %v106_v11 = vmul.f32 %v88_v1, %v86_v0  ;;  %v386_v13 = vmov -1e+30   ;;  %s388_s2 = smov [#allocation12]   ;;  %s389_s24 = smov [#allocation13]  }
  0x38   :  { %v94_v5 = vmul.f32 %v87_v2, %v87_v2  ;;  %v102_v6 = vmul.f32 %v87_v2, %v86_v0  ;;  %83 = vst.msk [vmem:[#allocation4] sm:$0x1] %vm81_vm1, %v386_v13  ;;  %v387_v14 = vmov 0.0   ;;  %82 = vst.msk [vmem:[#allocation2] sm:$0x1] %vm81_vm1, %v386_v13  ;;  %v138_v38 = vshrl.u32 %v137_v33, 7 }
  0x39   :  { %v91_v7 = vsel %vm90_vm0, %v89_v3, 0.0  ;;  %v99_v8 = vsel %vm90_vm0, %v98_v4, 0.0  ;;  %v107_v12 = vsel %vm90_vm0, %v106_v11, 0.0  ;;  %85 = vst.msk [vmem:[#allocation5] sm:$0x1] %vm81_vm1, %v387_v14  ;;  %vm145_vm2 = vcmask 7168  }
  0x3a   :  { %92 = vadd.xlane.f32.xlu0 %v91_v7  ;;  %100 = vadd.xlane.f32.xlu1 %v99_v8  ;;  %v95_v9 = vsel %vm90_vm0, %v94_v5, 0.0  ;;  %v103_v10 = vsel %vm90_vm0, %v102_v6, 0.0  ;;  %84 = vst.msk [vmem:[#allocation3] sm:$0x1] %vm81_vm1, %v387_v14  ;;  %v139_v44 = vsub.s32 0, %v138_v38  ;;  %s210_s23 = sshll.u32 %s388_s2, 4  ;;  %s211_s23 = int_to_ptr.vmem [resolvable:$true] %s210_s23 }
  0x3b   :  { %s220_s25 = sshll.u32 %s389_s24, 4  ;;  %s331_s26 = scalar_lea.vmem %s211_s23, 16  ;;  %s221_s25 = int_to_ptr.vmem [resolvable:$true] %s220_s25 }
  0x3c   :  { %p332_p10 = scmp.ne.s32.totalorder %s211_s23, %s331_s26  ;;  %s335_s27 = scalar_lea.vmem %s211_s23, 32 }
  0x3d   :  { %p336_p11 = scmp.lt.s32.totalorder %s211_s23, %s211_s23  ;;  %p337_p12 = scmp.lt.s32.totalorder %s335_s27, %s331_s26 }
  0x3e   :  { %96 = vadd.xlane.f32.xlu0 %v95_v9  ;;  %104 = vadd.xlane.f32.xlu1 %v103_v10 }
  0x3f   :  { %v123_v43 = vld [vmem:[#allocation2] sm:$0x1]  ;;  %v157_v49 = vld [vmem:[#allocation4] sm:$0x1]  ;;  %p338_p13 = por %p337_p12, %p336_p11 }
  0x41   :  { %v131_v9 = vld [vmem:[#allocation3] sm:$0x1]  ;;  %p339_p0 = pnand %p338_p13, %p332_p10 }
  0x42   :  { %108 = vadd.xlane.f32.xlu0 %v107_v12 }
  0xc7   :  { %v93_v15 = vpop.xlane.xlu0 %92  ;;  %v101_v16 = vpop.xlane.xlu1 %100 }
  0xc8   :  { %247 = vrsqrt.f32 %v93_v15 }
  0xc9   :  { %249 = vrsqrt.f32 %v101_v16  ;;  %v165_v16 = vld [vmem:[#allocation5] sm:$0x1] }
  0xcb   :  { %v97_v17 = vpop.xlane.xlu0 %96  ;;  %v105_v23 = vpop.xlane.xlu1 %104 }
  0xcc   :  { %251 = vrsqrt.f32 %v97_v17 }
  0xcf   :  { %v109_v19 = vpop.xlane.xlu0 %108 }
  0xd2   :  { %v248_v18 = vpop.eup %247 }
  0xd3   :  { %v250_v20 = vpop.eup %249  ;;  %v111_v21 = vmin.f32 %v248_v18, 1e+08 }
  0xd4   :  { %v115_v22 = vmin.f32 %v250_v20, 1e+08 }
  0xd5   :  { %v119_v24 = vmul.f32 %v111_v21, %v109_v19  ;;  %v116_v27 = vmul.f32 %v111_v21, %v105_v23 }
  0xd6   :  { %v252_v25 = vpop.eup %251 }
  0xd7   :  { %v113_v26 = vmin.f32 %v252_v25, 1e+08  ;;  %v120_v28 = vmul.f32 %v119_v24, %v115_v22 }
  0xd9   :  { %v117_v29 = vmul.f32 %v116_v27, %v113_v26  ;;  %v121_v30 = vmul.f32 20.0, %v120_v28 }
  0xdb   :  { %v118_v31 = vmul.f32 20.0, %v117_v29  ;;  %v124_v32 = vrot.slane %v121_v30, 4 }
  0xdd   :  { %v122_v34 = vsub.f32 0.0, %v118_v31  ;;  %v125_v35 = vmax.f32 %v121_v30, %v124_v32 }
  0xdf   :  { %v158_v36 = vrot.slane %v122_v34, 4  ;;  %v126_v37 = vrot.slane %v125_v35, 2 }
  0xe1   :  { %v159_v39 = vmax.f32 %v122_v34, %v158_v36  ;;  %v127_v40 = vmax.f32 %v125_v35, %v126_v37 }
  0xe3   :  { %v160_v41 = vrot.slane %v159_v39, 2  ;;  %v128_v42 = vrot.slane %v127_v40, 1 }
  0xe5   :  { %v161_v45 = vmax.f32 %v159_v39, %v160_v41  ;;  %v129_v46 = vmax.f32 %v127_v40, %v128_v42 }
  0xe7   :  { %v162_v47 = vrot.slane %v161_v45, 1  ;;  %v130_v48 = vmax.f32 %v123_v43, %v129_v46 }
  0xe9   :  { %v163_v50 = vmax.f32 %v161_v45, %v162_v47  ;;  %v140_v51 = vrot.slane %v130_v48, %v139_v44  ;;  %156 = vst.msk [vmem:[#allocation2] sm:$0x1] %vm81_vm1, %v130_v48  ;;  %v132_v57 = vsub.f32 %v123_v43, %v130_v48 }
  0xeb   :  { %v164_v52 = vmax.f32 %v157_v49, %v163_v50  ;;  %v142_v53 = vsub.f32 %v121_v30, %v140_v51  ;;  %v133_v60 = vmul.f32 1.442695, %v132_v57 }
  0xed   :  { %v174_v54 = vrot.slane %v164_v52, %v139_v44  ;;  %188 = vst.msk [vmem:[#allocation4] sm:$0x1] %vm81_vm1, %v164_v52  ;;  %v143_v55 = vmul.f32 1.442695, %v142_v53  ;;  %v166_v59 = vsub.f32 %v157_v49, %v164_v52 }
  0xef   :  { %v176_v56 = vsub.f32 %v122_v34, %v174_v54  ;;  %253 = vpow2.f32 %v143_v55  ;;  %v167_v61 = vmul.f32 1.442695, %v166_v59 }
  0xf0   :  { %v192_v26 = vld [vmem:[#allocation2] sm:$0x1] }
  0xf1   :  { %v177_v58 = vmul.f32 1.442695, %v176_v56 }
  0xf3   :  { %255 = vpow2.f32 %v177_v58 }
  0xf4   :  { %257 = vpow2.f32 %v133_v60 }
  0xf5   :  { %259 = vpow2.f32 %v167_v61 }
  0xf9   :  { %v254_v62 = vpop.eup %253 }
  0xfa   :  { %v146_v63 = vsel %vm145_vm2, %v254_v62, 0.0 }
  0xfb   :  { %v147_v0 = vrot.slane %v146_v63, 4 }
  0xfd   :  { %v256_v1 = vpop.eup %255  ;;  %v148_v2 = vadd.f32 %v147_v0, %v146_v63 }
  0xfe   :  { %v179_v3 = vsel %vm145_vm2, %v256_v1, 0.0  ;;  %v258_v8 = vpop.eup %257 }
  0xff   :  { %v180_v4 = vrot.slane %v179_v3, 4  ;;  %v149_v5 = vrot.slane %v148_v2, 2  ;;  %v135_v13 = vmul.f32 %v258_v8, %v131_v9  ;;  %v260_v15 = vpop.eup %259 }
 0x100   :  { %v169_v19 = vmul.f32 %v260_v15, %v165_v16 }
 0x101   :  { %v181_v6 = vadd.f32 %v180_v4, %v179_v3  ;;  %v150_v7 = vadd.f32 %v149_v5, %v148_v2 }
 0x103   :  { %v182_v10 = vrot.slane %v181_v6, 2  ;;  %v151_v11 = vrot.slane %v150_v7, 1 }
 0x105   :  { %v183_v12 = vadd.f32 %v182_v10, %v181_v6  ;;  %v152_v14 = vadd.f32 %v151_v11, %v150_v7 }
 0x107   :  { %v184_v17 = vrot.slane %v183_v12, 1  ;;  %v153_v18 = vadd.f32 %v152_v14, %v135_v13 }
 0x109   :  { %v185_v20 = vadd.f32 %v184_v17, %v183_v12  ;;  %155 = vst.msk [vmem:[#allocation3] sm:$0x1] %vm81_vm1, %v153_v18 }
 0x10b   :  { %v186_v21 = vadd.f32 %v185_v20, %v169_v19 }
 0x10d   :  { %187 = vst.msk [vmem:[#allocation5] sm:$0x1] %vm81_vm1, %v186_v21 }
 0x110   :  { %v193_v22 = vld [vmem:[#allocation3] sm:$0x1] }
 0x111   :  { %261 = vlog2.f32 %v193_v22 }
 0x114   :  { %v199_v23 = vld [vmem:[#allocation5] sm:$0x1] }
 0x115   :  { %263 = vlog2.f32 %v199_v23 }
 0x11b   :  { %v262_v24 = vpop.eup %261 }
 0x11c   :  { %v195_v25 = vmul.f32 0.6931472, %v262_v24 }
 0x11e   :  { %v196_v27 = vadd.f32 %v195_v25, %v192_v26 }
 0x11f   :  { %v264_v28 = vpop.eup %263 }
 0x120   :  { %197 = vst.msk [vmem:[#allocation12] sm:$0x1] %vm81_vm1, %v196_v27  ;;  %v201_v29 = vmul.f32 0.6931472, %v264_v28 }
 0x121   :  { %342 = shalt.err (!%p339_p0)
}
 0x122   :  { %s343_s30 = scalar_lea.hbm %s493_s3, 16 }
 0x123   :  { %p344_p1 = scmp.ne.s32.totalorder %s493_s3, %s343_s30  ;;  %p347_p2 = scmp.lt.u32.totalorder %s343_s30, %s493_s3 }
 0x125   :  { %p349_p3 = pnand %p347_p2, %p344_p1 }
 0x127   :  { %352 = shalt.err (!%p349_p3)
}
 0x128   :  { %213 = dma.vmem_to_hbm [thread:$0]  %s211_s23, 16, %s493_s3, [#allocation8]   ;;  %v198_v30 = vld [vmem:[#allocation4] sm:$0x1] }
 0x129   :  { %v202_v31 = vadd.f32 %v201_v29, %v198_v30  ;;  %s353_s1 = scalar_lea.vmem %s221_s25, 16  ;;  %s357_s11 = scalar_lea.vmem %s221_s25, 32 }
 0x12a   :  { %p354_p4 = scmp.ne.s32.totalorder %s221_s25, %s353_s1  ;;  %p358_p5 = scmp.lt.s32.totalorder %s221_s25, %s221_s25 }
 0x12b   :  { %203 = vst.msk [vmem:[#allocation13] sm:$0x1] %vm81_vm1, %v202_v31  ;;  %p359_p6 = scmp.lt.s32.totalorder %s357_s11, %s353_s1 }
 0x12d   :  { %p360_p7 = por %p359_p6, %p358_p5 }
 0x12f   :  { %p361_p8 = pnand %p360_p7, %p354_p4 }
 0x131   :  { %364 = shalt.err (!%p361_p8)
}
 0x132   :  { %s365_s14 = scalar_lea.hbm %s494_s4, 16 }
 0x133   :  { %p366_p9 = scmp.ne.s32.totalorder %s494_s4, %s365_s14  ;;  %p369_p10 = scmp.lt.u32.totalorder %s365_s14, %s494_s4 }
 0x135   :  { %p371_p11 = pnand %p369_p10, %p366_p9 }
 0x137   :  { %374 = shalt.err (!%p371_p11)
}
 0x138   :  { %223 = dma.vmem_to_hbm [thread:$0]  %s221_s25, 16, %s494_s4, [#allocation14]  }
 0x139   :  { %379 = dma.done.wait [#allocation8], 16  }
 0x13a   :  { %380 = vsyncadd [#allocation8], 4294967280 }
 0x13b   :  { %381 = dma.done.wait [#allocation14], 16  }
 0x13c   :  { %382 = vsyncadd [#allocation14], 4294967280 }
 0x13d   :  { %230 = vsyncpa [#allocation7], 1 }
 0x13e   :  { %231 = vsyncpa [#allocation10], 1 }
 0x13f   :  { %232 = vsyncpa [#allocation8], 1 }
 0x140   :  { %233 = vsyncpa [#allocation14], 1 }

</bundles_post_ra>
